<compile_context>
chip_gen: v7x
topology: tpu7x:2x2x1
jax: 0.10.0
libtpu: 0.0.40
codegen_flags: <defaults>
</compile_context>

<pallas_src>
import math

import jax
import jax.numpy as jnp
from jax.experimental import pallas as pl
from jax.experimental.pallas import tpu as pltpu


# ----------------------------------------------------------------------------
# Kernel: x_tile (TS, D) + pe_tile (TS, D)  ->  out_tile (TS, D)
# (batch dim of the x/out blocks is squeezed away by the BlockSpec)
# ----------------------------------------------------------------------------
def _pe_add_kernel(x_ref, pe_ref, o_ref):
    # Do the add in f32 (pe is f32); cast back to the output dtype on store so
    # bf16 activations are handled correctly (no bf16 VPU on v5e anyway).
    o_ref[...] = (x_ref[...].astype(jnp.float32) + pe_ref[...]).astype(o_ref.dtype)


# ----------------------------------------------------------------------------
# "register_buffer" equivalent: precompute pe once (max_len, d_model)
# ----------------------------------------------------------------------------
def make_positional_encoding_buffer(d_model, max_len=5000):
    assert d_model % 2 == 0, "d_model must be even (same as the PyTorch module)"
    position = jnp.arange(max_len, dtype=jnp.float32)[:, None]           # (L, 1)
    div_term = jnp.exp(
        jnp.arange(0, d_model, 2, dtype=jnp.float32) * (-math.log(10000.0) / d_model)
    )                                                                     # (D/2,)
    angles = position * div_term                                          # (L, D/2)
    pe = jnp.zeros((max_len, d_model), jnp.float32)
    pe = pe.at[:, 0::2].set(jnp.sin(angles))
    pe = pe.at[:, 1::2].set(jnp.cos(angles))
    return pe


# ----------------------------------------------------------------------------
# Tile-size selection: aim for ~1 MB per x/out buffer (keeps
# 2x-double-buffered x + out + pe well under the v7x scoped-VMEM budget while
# amortizing the ~0.35us per-grid-step overhead).
# ----------------------------------------------------------------------------
def _choose_seq_tile(s_eff, d_eff, itemsize, target_bytes=1 << 20):
    rows = max(8, (target_bytes // (d_eff * itemsize)) // 8 * 8)
    if rows >= s_eff:
        return s_eff                       # full dim: always a legal block
    # prefer a divisor of s_eff that is a multiple of 8 (sublane constraint)
    for ts in range(rows, 7, -8):
        if s_eff % ts == 0:
            return ts
    return s_eff                           # fallback: one full block


# ----------------------------------------------------------------------------
# Forward: x (B, S, D)  ->  x + pe[:S]   (dropout = identity in eval mode)
# ----------------------------------------------------------------------------
def positional_encoding_forward(x, pe):
    B, S, D = x.shape
    assert pe.shape[0] >= S and pe.shape[1] == D
    itemsize = jnp.dtype(x.dtype).itemsize

    # Pre-slice pe so the pe block can equal the full array dims.
    pe_s = pe[:S]

    # Lane-dense packing: fold k sequence rows into the lane dim when D < 128.
    k = 1
    if D < 128 and 128 % D == 0 and S % (128 // D) == 0:
        k = 128 // D
    s_eff, d_eff = S // k, D * k
    x_r = x.reshape(B, s_eff, d_eff)
    pe_r = pe_s.reshape(s_eff, d_eff)

    ts = _choose_seq_tile(s_eff, d_eff, itemsize)
    grid = (s_eff // ts, B)                 # seq tiles outer, batch inner

    out = pl.pallas_call(
        _pe_add_kernel,
        grid=grid,
        in_specs=[
            # x: one (ts, d_eff) tile per (seq_tile, batch) step; batch dim
            # squeezed out of the kernel view. Last dim = full d_eff (>=128).
            pl.BlockSpec((None, ts, d_eff), lambda s, b: (b, s, 0)),
            # pe: depends only on the seq-tile index -> fetched once per seq
            # tile, reused across the inner batch axis (no redundant DMA).
            pl.BlockSpec((ts, d_eff), lambda s, b: (s, 0)),
        ],
        out_specs=pl.BlockSpec((None, ts, d_eff), lambda s, b: (b, s, 0)),
        out_shape=jax.ShapeDtypeStruct((B, s_eff, d_eff), x.dtype),
        compiler_params=pltpu.CompilerParams(
            dimension_semantics=("parallel", "parallel"),
            vmem_limit_bytes=32 << 20,
        ),
        cost_estimate=pl.CostEstimate(
            flops=B * S * D,
            transcendentals=0,
            bytes_accessed=(2 * B * S * D) * itemsize + S * D * 4,
        ),
    )(x_r, pe_r)

    return out.reshape(B, S, D)


# ----------------------------------------------------------------------------
if __name__ == "__main__":
    d_model = 32
    max_len = 5000
    batch, seq = 2, 8
    dropout_p = 0.1  # identity in eval mode

    key = jax.random.PRNGKey(0)
    x = jax.random.normal(key, (batch, seq, d_model), jnp.float32)

    pe = make_positional_encoding_buffer(d_model, max_len)

    fwd = jax.jit(positional_encoding_forward)
    out = fwd(x, pe)
    jax.block_until_ready(out)

    # pure-JAX reference check
    ref = x + pe[None, :seq, :]
    assert out.shape == (batch, seq, d_model)
    assert bool(jnp.all(jnp.isfinite(out)))
    assert bool(jnp.allclose(out, ref, atol=1e-6, rtol=1e-6))
    print("KERNEL_OK")
</pallas_src>

<mosaic_0001>
module attributes {stable_mosaic.version = 11 : i64} {
  func.func @_pe_add_kernel(%arg0: i32, %arg1: i32, %arg2: memref<1x2x128xf32, #tpu.memory_space<vmem>>, %arg3: memref<2x128xf32, #tpu.memory_space<vmem>>, %arg4: memref<1x2x128xf32, #tpu.memory_space<vmem>>) attributes {dimension_semantics = [#tpu.dimension_semantics<parallel>, #tpu.dimension_semantics<parallel>], iteration_bounds = array<i64: 1, 2>, scalar_prefetch = 0 : i64, scratch_operands = 0 : i64, tpu.core_type = #tpu.core_type<tc>, window_params = [{transform_indices = @transform_0, window_bounds = array<i64: 1, 2, 128>}, {transform_indices = @transform_1, window_bounds = array<i64: 2, 128>}, {transform_indices = @transform_2, window_bounds = array<i64: 1, 2, 128>}]} {
    %c0 = arith.constant 0 : index
    %c0_0 = arith.constant 0 : index
    %c0_1 = arith.constant 0 : index
    %0 = vector.load %arg2[%c0, %c0_0, %c0_1] : memref<1x2x128xf32, #tpu.memory_space<vmem>>, vector<1x2x128xf32>
    %1 = vector.shape_cast %0 : vector<1x2x128xf32> to vector<2x128xf32>
    %c0_2 = arith.constant 0 : index
    %c0_3 = arith.constant 0 : index
    %2 = vector.load %arg3[%c0_2, %c0_3] : memref<2x128xf32, #tpu.memory_space<vmem>>, vector<2x128xf32>
    %3 = arith.addf %1, %2 : vector<2x128xf32>
    %c0_4 = arith.constant 0 : index
    %c0_5 = arith.constant 0 : index
    %c0_6 = arith.constant 0 : index
    %4 = vector.load %arg4[%c0_4, %c0_5, %c0_6] : memref<1x2x128xf32, #tpu.memory_space<vmem>>, vector<1x2x128xf32>
    %5 = vector.shape_cast %4 : vector<1x2x128xf32> to vector<2x128xf32>
    %6 = vector.shape_cast %3 : vector<2x128xf32> to vector<1x2x128xf32>
    tpu.vector_store %arg4[%c0_4, %c0_5, %c0_6], %6 {strides = array<i32>} : memref<1x2x128xf32, #tpu.memory_space<vmem>>, vector<1x2x128xf32>,
    return
  }
  func.func @transform_0(%arg0: i32, %arg1: i32) -> (i32, i32, i32) {
    %c0_i32 = arith.constant 0 : i32
    %c0_i32_0 = arith.constant 0 : i32
    return %arg1, %arg0, %c0_i32 : i32, i32, i32
  }
  func.func @transform_1(%arg0: i32, %arg1: i32) -> (i32, i32) {
    %c0_i32 = arith.constant 0 : i32
    %c0_i32_0 = arith.constant 0 : i32
    return %arg0, %c0_i32 : i32, i32
  }
  func.func @transform_2(%arg0: i32, %arg1: i32) -> (i32, i32, i32) {
    %c0_i32 = arith.constant 0 : i32
    %c0_i32_0 = arith.constant 0 : i32
    return %arg1, %arg0, %c0_i32 : i32, i32, i32
  }
}

</mosaic_0001>

<bundles_post_ra>
// kernel: positional_encoding_forward.1
= control target key start
LH: loop header
LB: loop body
LE: loop exit
PB: predicated region body
PF: predicated region fallthrough
CT: control target
= control target key end

     0   :  { %s354_s9 = smov 0   ;;  %s331_s10 = smov 0   ;;  %s368_s0 = inlined_call_operand.vmem [shape: f32[2,2,128], index: 0, kind: input, shape index: {}]   ;;  %s369_s1 = inlined_call_operand.vmem [shape: f32[2,128], index: 1, kind: input, shape index: {}]   ;;  %s370_s2 = inlined_call_operand.vmem [shape: f32[2,2,128], index: 2, kind: output, shape index: {}]  }
   0x1   :  { %s335_s11 = smov 0  }
   0x2 LB: > { %s21_s12 = sadd.s32 1, %s333_s10  ;;  %p286_p0 = scmp.ge.s32.totalorder %s337_s11, 1  ;;  %s337_s11 = sphi %s335_s11, %s12_s11   ;;  %s333_s10 = sphi %s331_s10, %s332_s10   ;;  %s329_s9 = sphi %s354_s9, %s371_s9  }
   0x3   : > { %p22_p1 = scmp.ge.s32.totalorder %s21_s12, 2  ;;  %p139_p2 = scmp.lt.s32.totalorder %s337_s11, 3 }
   0x5   : > { %s373_s12 = smov (%p22_p1, %s21_s12), 0  ;;  %p140_p3 = pnand %p286_p0, %p139_p2 }
   0x6   : > { %p169_p4 = scmp.lt.s32.totalorder (!%p140_p3), %s329_s9, 1  ;;  %v188_v0 = vld [vmem:[%s369_s1] sm:$0x3] (!%p140_p3) }
   0x7   : > { %143 = sbr.rel (%p140_p3) target bundleno = 21 (0x15), region = 28 }
   0xe   : > { %s375_s9 = smov (!%p169_p4, %s329_s9), 1 }
   0xf   : > { %s287_s13 = sshll.u32 %s375_s9, 1 }
  0x10   : > { %s175_s18 = scalar_lea.vmem %s368_s0, %s287_s13  ;;  %s186_s21 = scalar_lea.vmem %s370_s2, %s287_s13 }
  0x11   : > { %v187_v1 = vld [vmem:[%s175_s18] sm:$0x3] }
  0x12   : > { %v189_v2 = vadd.f32 %v188_v0, %v187_v1 }
  0x14   : > { %190 = vst [vmem:[%s186_s21] sm:$0x3] %v189_v2 }
  0x15 PF: > { %s12_s11 = sadd.s32 1, %s337_s11   ;;  %s371_s9 = smov %s333_s10 }
  0x16   : > { %p9_p5 = scmp.ge.s32.totalorder %s12_s11, 4   ;;  %s332_s10 = smov %s373_s12  }
  0x18   :  { %11 = sbr.rel (!%p9_p5) target bundleno = 2 (0x2), region = 61 }

</bundles_post_ra>
